<compile_context>
chip_gen: v5e
topology: v5e:2x2
jax: 0.10.0
libtpu: 0.0.40
codegen_flags: <defaults>
</compile_context>

<pallas_src>
import functools

import jax
import jax.numpy as jnp
from jax.experimental import pallas as pl
from jax.experimental.pallas import tpu as pltpu


def _round_up(v, m):
    return ((v + m - 1) // m) * m


def prepare_gat_params(W_all, a_all, *, size_in, size_out, heads, dtype=jnp.bfloat16):
    """One-time (init/update-time) packing of the GAT weights for the kernel.

    Returns (wpack, meta):
      wpack : (rows, hs_pad) `dtype` slab holding
                rows [0, heads*size_in)        : block-diagonal W^T (contraction-major,
                                                 zero-padded columns up to hs_pad)
                rows [aw_off, aw_off+2*heads)  : aW = [a1_blk; a2_blk] @ W  in cols [0, size_in)
      meta  : static ints needed by the wrapper / kernel.
    """
    HS = heads * size_out
    hs_pad = max(128, _round_up(HS, 128))          # lane-dense output width
    wt_rows = heads * size_in
    aw_off = _round_up(wt_rows, 8)                  # sublane-aligned section offset
    rows = _round_up(aw_off + 2 * heads, 8)

    W_all = W_all.astype(jnp.float32)
    a_all = a_all.astype(jnp.float32)

    # aW[h]       = a1_h^T @ W_h  (applied to the target-node column)
    # aW[heads+h] = a2_h^T @ W_h  (applied to the neighbor columns)
    a1 = a_all[:, :size_out, 0]                     # (heads, size_out)
    a2 = a_all[:, size_out:, 0]                     # (heads, size_out)
    aW = jnp.concatenate([jnp.einsum('ho,hoi->hi', a1, W_all),
                          jnp.einsum('ho,hoi->hi', a2, W_all)], axis=0)   # (2*heads, size_in)

    # Block-diagonal W^T on the contraction axis: z_flat = y_flat @ wt_bd lands every head's
    # output in its own column block of one flat, lane-dense row (single unmasked store).
    wpack = jnp.zeros((rows, hs_pad), jnp.float32)
    for h in range(heads):
        wpack = wpack.at[h * size_in:(h + 1) * size_in,
                         h * size_out:(h + 1) * size_out].set(W_all[h].T)
    wpack = wpack.at[aw_off:aw_off + 2 * heads, :size_in].set(aW)

    meta = dict(size_in=size_in, size_out=size_out, heads=heads,
                hs=HS, hs_pad=hs_pad, aw_off=aw_off)
    return wpack.astype(dtype), meta


def _gat_kernel(xnv_ref, nx_ref, wpack_ref, out_ref, yflat_ref, *,
                size_in, size_out, heads, aw_off):
    """One target node per grid step; all heads fused; 3 MXU dots total.

    xnv_ref  : (1, size_in, N+1) bf16  -- col 0 = x^T, cols 1..N = n_x.view(size_in, N)
    nx_ref   : (1, N, size_in)   bf16  -- original neighbor rows (for the aggregation)
    wpack_ref: (rows, hs_pad)    bf16  -- packed weights (see prepare_gat_params)
    out_ref  : (1, 1, hs_pad)    f32   -- lane-dense output row; cols >= heads*size_out padded
    yflat_ref: (1, heads*size_in) f32  -- VMEM scratch used to lay the per-head y's out flat
    """
    f32 = jnp.float32
    xnv = xnv_ref[0]                                          # (size_in, N+1)
    nx = nx_ref[0]                                            # (N, size_in)
    wt_bd = wpack_ref[0:heads * size_in, :]                   # (heads*size_in, hs_pad)
    aw = wpack_ref[aw_off:aw_off + 2 * heads, 0:size_in]      # (2*heads, size_in)

    # Energies for every head in one MXU op:
    #   row h,        col 0     : a1_h . (W_h x)
    #   row heads+h,  col 1+k   : a2_h . (W_h n_k)
    e_all = jnp.dot(aw, xnv, preferred_element_type=f32)      # (2*heads, N+1)
    energy = e_all[:heads, 0:1] + e_all[heads:2 * heads, 1:]  # (heads, N)

    # Numerically stable softmax over neighbors (kept f32 on the VPU, exact division).
    m = jnp.max(energy, axis=1, keepdims=True)
    p = jnp.exp(energy - m)
    alpha = p / jnp.sum(p, axis=1, keepdims=True)             # (heads, N)

    # Aggregate the raw neighbor features for every head at once.
    y = jnp.dot(alpha.astype(nx.dtype), nx, preferred_element_type=f32)   # (heads, size_in)

    # Lay the per-head rows out flat along lanes (tiny static stores) so the block-diagonal
    # W^T produces all head outputs in one flat, lane-dense row (no head x head waste,
    # no cross-sublane reduce).
    for h in range(heads):
        yflat_ref[0:1, h * size_in:(h + 1) * size_in] = y[h:h + 1, :]
    y_flat = yflat_ref[...]                                   # (1, heads*size_in)

    z = jnp.dot(y_flat.astype(wt_bd.dtype), wt_bd,
                preferred_element_type=f32)                   # (1, hs_pad)
    out_ref[0] = jax.nn.sigmoid(z)                            # padded lanes hold 0.5, sliced off


def gat_layer_pallas(x, n_x, wpack, meta, *, mean=None):
    """Batched GATLayer.forward.

    x   : (B, size_in)        target node features
    n_x : (B, N, size_in)     per-node neighborhoods  (a (N, size_in) array is also accepted)
    Returns (B, size_out, heads) (or (B, size_out) if mean), equal to applying the PyTorch
    module independently to every (x[b:b+1], n_x[b]) pair.
    """
    size_in, size_out, heads = meta['size_in'], meta['size_out'], meta['heads']
    hs, hs_pad, aw_off = meta['hs'], meta['hs_pad'], meta['aw_off']

    if x.ndim == 1:
        x = x[None]
    if n_x.ndim == 2:
        n_x = n_x[None]
    B = x.shape[0]
    N = n_x.shape[1]

    # torch .view() reinterpretations (layout plumbing) + projection merge:
    # x^T becomes column 0 of the reinterpreted neighbor operand (one operand, one dot).
    nv = n_x.reshape(B, size_in, N)                       # per-node n_x.view(size_in, -1)
    xnv = jnp.concatenate([x[:, :, None], nv], axis=2)    # (B, size_in, N+1)

    xnv = xnv.astype(wpack.dtype)                         # bf16 MXU operands, f32 accumulation
    nxb = n_x.astype(wpack.dtype)
    rows = wpack.shape[0]

    kernel = functools.partial(_gat_kernel, size_in=size_in, size_out=size_out,
                               heads=heads, aw_off=aw_off)

    out = pl.pallas_call(
        kernel,
        out_shape=jax.ShapeDtypeStruct((B, 1, hs_pad), jnp.float32),
        grid=(B,),
        in_specs=[
            pl.BlockSpec((1, size_in, N + 1), lambda b: (b, 0, 0)),
            pl.BlockSpec((1, N, size_in), lambda b: (b, 0, 0)),
            pl.BlockSpec((rows, hs_pad), lambda b: (0, 0)),   # constant: fetched once
        ],
        out_specs=pl.BlockSpec((1, 1, hs_pad), lambda b: (b, 0, 0)),
        scratch_shapes=[pltpu.VMEM((1, heads * size_in), jnp.float32)],
        compiler_params=pltpu.CompilerParams(
            dimension_semantics=("parallel",)),               # v7x: shard nodes across both TCs
    )(xnv, nxb, wpack)

    out = out[:, 0, :hs].reshape(B, heads, size_out)
    out = jnp.transpose(out, (0, 2, 1))                       # (B, size_out, heads)
    if mean:
        out = out.mean(axis=2)
    return out


def gat_layer_ref(x, n_x, W_all, a_all, *, size_in, size_out, heads, mean=None):
    """Pure-JAX f32 reference mirroring the PyTorch module line by line (per node, per head)."""
    B = x.shape[0]
    outs_b = []
    for b in range(B):
        outs = []
        for h in range(heads):
            W = W_all[h]
            a = a_all[h]
            xv = x[b].reshape(size_in, 1)                   # x.view(size_in, -1)
            nv = n_x[b].reshape(size_in, -1)                # n_x.view(size_in, -1) (view, not T)
            hx = W @ xv                                     # (size_out, 1)
            hn = W @ nv                                     # (size_out, N)
            energy = a.T @ jnp.concatenate(
                [jnp.tile(hx, (1, hn.shape[1])), hn], axis=0)   # (1, N)
            alpha = jax.nn.softmax(energy, axis=1)
            y = (alpha @ n_x[b]).T                          # (size_in, 1)
            z = W @ y                                       # (size_out, 1)
            outs.append(jax.nn.sigmoid(z).T)                # (1, size_out)
        outs_b.append(jnp.stack(outs, axis=-1))             # (1, size_out, heads)
    out = jnp.concatenate(outs_b, axis=0)                   # (B, size_out, heads)
    if mean:
        out = out.mean(axis=2)
    return out


def xavier_uniform(key, shape, fan_in, fan_out, dtype=jnp.float32):
    bound = (6.0 / (fan_in + fan_out)) ** 0.5
    return jax.random.uniform(key, shape, dtype=dtype, minval=-bound, maxval=bound)


if __name__ == "__main__":
    size_in, size_out, heads, N, B = 16, 32, 2, 8, 4

    key = jax.random.PRNGKey(0)
    k_x, k_nx, k_w, k_a = jax.random.split(key, 4)

    x = jax.random.normal(k_x, (B, size_in), dtype=jnp.float32)
    n_x = jax.random.normal(k_nx, (B, N, size_in), dtype=jnp.float32)

    # Deterministic Xavier-uniform init (same fan rules as torch.nn.init.xavier_uniform_).
    W_all = jnp.stack([
        xavier_uniform(k, (size_out, size_in), fan_in=size_in, fan_out=size_out)
        for k in jax.random.split(k_w, heads)
    ])
    a_all = jnp.stack([
        xavier_uniform(k, (2 * size_out, 1), fan_in=1, fan_out=2 * size_out)
        for k in jax.random.split(k_a, heads)
    ])

    # Weight packing is done ONCE, outside the forward path (per the perf review).
    wpack, meta = prepare_gat_params(W_all, a_all,
                                     size_in=size_in, size_out=size_out, heads=heads)

    out = gat_layer_pallas(x, n_x, wpack, meta, mean=None)
    out = jax.block_until_ready(out)

    ref = gat_layer_ref(x, n_x, W_all, a_all,
                        size_in=size_in, size_out=size_out, heads=heads, mean=None)

    assert out.shape == (B, size_out, heads), out.shape
    err = float(jnp.max(jnp.abs(out - ref)))
    # Tolerance re-derived for bf16 MXU operands (f32 accumulation, f32 softmax/sigmoid):
    # worst-case propagated rounding through energies -> softmax -> projection -> sigmoid
    # is ~1e-2 on sigmoid outputs in (0, 1).
    assert jnp.allclose(out, ref, atol=2e-2, rtol=2e-2), err
    print("KERNEL_OK")
</pallas_src>

<mosaic_0001>
module attributes {stable_mosaic.version = 11 : i64} {
  func.func @_gat_kernel(%arg0: i32, %arg1: memref<1x16x9xbf16, #tpu.memory_space<vmem>>, %arg2: memref<1x8x16xbf16, #tpu.memory_space<vmem>>, %arg3: memref<40x128xbf16, #tpu.memory_space<vmem>>, %arg4: memref<1x1x128xf32, #tpu.memory_space<vmem>>, %arg5: memref<1x32xf32, #tpu.memory_space<vmem>>) attributes {dimension_semantics = [#tpu.dimension_semantics<parallel>], iteration_bounds = array<i64: 4>, scalar_prefetch = 0 : i64, scratch_operands = 1 : i64, tpu.core_type = #tpu.core_type<tc>, window_params = [{transform_indices = @transform_0, window_bounds = array<i64: 1, 16, 9>}, {transform_indices = @transform_1, window_bounds = array<i64: 1, 8, 16>}, {pipeline_mode = #tpu.pipeline_mode<synchronous>, transform_indices = @transform_2, window_bounds = array<i64: 40, 128>}, {transform_indices = @transform_3, window_bounds = array<i64: 1, 1, 128>}]} {
    %c0 = arith.constant 0 : index
    %c0_0 = arith.constant 0 : index
    %c0_1 = arith.constant 0 : index
    %0 = vector.load %arg1[%c0, %c0_0, %c0_1] : memref<1x16x9xbf16, #tpu.memory_space<vmem>>, vector<1x16x9xbf16>
    %1 = vector.shape_cast %0 : vector<1x16x9xbf16> to vector<16x9xbf16>
    %c0_2 = arith.constant 0 : index
    %c0_3 = arith.constant 0 : index
    %c0_4 = arith.constant 0 : index
    %2 = vector.load %arg2[%c0_2, %c0_3, %c0_4] : memref<1x8x16xbf16, #tpu.memory_space<vmem>>, vector<1x8x16xbf16>
    %3 = vector.shape_cast %2 : vector<1x8x16xbf16> to vector<8x16xbf16>
    %c0_5 = arith.constant 0 : index
    %c0_6 = arith.constant 0 : index
    %4 = vector.load %arg3[%c0_5, %c0_6] : memref<40x128xbf16, #tpu.memory_space<vmem>>, vector<32x128xbf16>
    %c32 = arith.constant 32 : index
    %c0_7 = arith.constant 0 : index
    %5 = vector.load %arg3[%c32, %c0_7] : memref<40x128xbf16, #tpu.memory_space<vmem>>, vector<4x16xbf16>
    %cst = arith.constant dense<0.000000e+00> : vector<4x9xf32>
    %6 = tpu.matmul %5, %1, %cst {dimension_numbers = #tpu.dot_dimension_numbers<[1], [0], [0], [1], [0, 0, 1, 1], [], []>} : vector<4x16xbf16>, vector<16x9xbf16>, vector<4x9xf32> -> vector<4x9xf32>
    %7 = vector.extract_strided_slice %6 {offsets = [0, 0], sizes = [2, 1], strides = [1, 1]} : vector<4x9xf32> to vector<2x1xf32>
    %8 = vector.extract_strided_slice %6 {offsets = [2, 1], sizes = [2, 8], strides = [1, 1]} : vector<4x9xf32> to vector<2x8xf32>
    %9 = vector.broadcast %7 : vector<2x1xf32> to vector<2x8xf32>
    %10 = arith.addf %9, %8 : vector<2x8xf32>
    %cst_8 = arith.constant dense<0xFF800000> : vector<2xf32>
    %11 = vector.multi_reduction <maximumf>, %10, %cst_8 [1] : vector<2x8xf32> to vector<2xf32>
    %12 = vector.shape_cast %11 : vector<2xf32> to vector<2x1xf32>
    %13 = vector.broadcast %12 : vector<2x1xf32> to vector<2x8xf32>
    %14 = arith.subf %10, %13 : vector<2x8xf32>
    %15 = math.exp %14 : vector<2x8xf32>
    %cst_9 = arith.constant dense<0.000000e+00> : vector<2xf32>
    %16 = vector.multi_reduction <add>, %15, %cst_9 [1] : vector<2x8xf32> to vector<2xf32>
    %17 = vector.shape_cast %16 : vector<2xf32> to vector<2x1xf32>
    %18 = vector.broadcast %17 : vector<2x1xf32> to vector<2x8xf32>
    %19 = arith.divf %15, %18 : vector<2x8xf32>
    %20 = arith.truncf %19 : vector<2x8xf32> to vector<2x8xbf16>
    %cst_10 = arith.constant dense<0.000000e+00> : vector<2x16xf32>
    %21 = tpu.matmul %20, %3, %cst_10 {dimension_numbers = #tpu.dot_dimension_numbers<[1], [0], [0], [1], [0, 0, 1, 1], [], []>} : vector<2x8xbf16>, vector<8x16xbf16>, vector<2x16xf32> -> vector<2x16xf32>
    %22 = vector.extract_strided_slice %21 {offsets = [0, 0], sizes = [1, 16], strides = [1, 1]} : vector<2x16xf32> to vector<1x16xf32>
    %c0_11 = arith.constant 0 : index
    %c0_12 = arith.constant 0 : index
    %23 = vector.load %arg5[%c0_11, %c0_12] : memref<1x32xf32, #tpu.memory_space<vmem>>, vector<1x16xf32>
    tpu.vector_store %arg5[%c0_11, %c0_12], %22 {strides = array<i32>} : memref<1x32xf32, #tpu.memory_space<vmem>>, vector<1x16xf32>,
    %24 = vector.extract_strided_slice %21 {offsets = [1, 0], sizes = [1, 16], strides = [1, 1]} : vector<2x16xf32> to vector<1x16xf32>
    %c0_13 = arith.constant 0 : index
    %c16 = arith.constant 16 : index
    %25 = vector.load %arg5[%c0_13, %c16] : memref<1x32xf32, #tpu.memory_space<vmem>>, vector<1x16xf32>
    tpu.vector_store %arg5[%c0_13, %c16], %24 {strides = array<i32>} : memref<1x32xf32, #tpu.memory_space<vmem>>, vector<1x16xf32>,
    %c0_14 = arith.constant 0 : index
    %c0_15 = arith.constant 0 : index
    %26 = vector.load %arg5[%c0_14, %c0_15] : memref<1x32xf32, #tpu.memory_space<vmem>>, vector<1x32xf32>
    %27 = arith.truncf %26 : vector<1x32xf32> to vector<1x32xbf16>
    %cst_16 = arith.constant dense<0.000000e+00> : vector<1x128xf32>
    %28 = tpu.matmul %27, %4, %cst_16 {dimension_numbers = #tpu.dot_dimension_numbers<[1], [0], [0], [1], [0, 0, 1, 1], [], []>} : vector<1x32xbf16>, vector<32x128xbf16>, vector<1x128xf32> -> vector<1x128xf32>
    %29 = arith.negf %28 : vector<1x128xf32>
    %30 = math.exp %29 : vector<1x128xf32>
    %cst_17 = arith.constant 1.000000e+00 : f32
    %31 = vector.broadcast %cst_17 : f32 to vector<1x128xf32>
    %32 = arith.addf %31, %30 : vector<1x128xf32>
    %33 = arith.divf %31, %32 : vector<1x128xf32>
    %c0_18 = arith.constant 0 : index
    %c0_19 = arith.constant 0 : index
    %c0_20 = arith.constant 0 : index
    %34 = vector.load %arg4[%c0_18, %c0_19, %c0_20] : memref<1x1x128xf32, #tpu.memory_space<vmem>>, vector<1x1x128xf32>
    %35 = vector.shape_cast %34 : vector<1x1x128xf32> to vector<1x128xf32>
    %36 = vector.shape_cast %33 : vector<1x128xf32> to vector<1x1x128xf32>
    tpu.vector_store %arg4[%c0_18, %c0_19, %c0_20], %36 {strides = array<i32>} : memref<1x1x128xf32, #tpu.memory_space<vmem>>, vector<1x1x128xf32>,
    return
  }
  func.func @transform_0(%arg0: i32) -> (i32, i32, i32) {
    %c0_i32 = arith.constant 0 : i32
    %c0_i32_0 = arith.constant 0 : i32
    %c0_i32_1 = arith.constant 0 : i32
    return %arg0, %c0_i32, %c0_i32_0 : i32, i32, i32
  }
  func.func @transform_1(%arg0: i32) -> (i32, i32, i32) {
    %c0_i32 = arith.constant 0 : i32
    %c0_i32_0 = arith.constant 0 : i32
    %c0_i32_1 = arith.constant 0 : i32
    return %arg0, %c0_i32, %c0_i32_0 : i32, i32, i32
  }
  func.func @transform_2(%arg0: i32) -> (i32, i32) {
    %c0_i32 = arith.constant 0 : i32
    %c0_i32_0 = arith.constant 0 : i32
    %c0_i32_1 = arith.constant 0 : i32
    return %c0_i32, %c0_i32_0 : i32, i32
  }
  func.func @transform_3(%arg0: i32) -> (i32, i32, i32) {
    %c0_i32 = arith.constant 0 : i32
    %c0_i32_0 = arith.constant 0 : i32
    %c0_i32_1 = arith.constant 0 : i32
    return %arg0, %c0_i32, %c0_i32_0 : i32, i32, i32
  }
}

</mosaic_0001>

<bundles_post_ra>
// kernel: tpu_custom_call.1
= control target key start
LH: loop header
LB: loop body
LE: loop exit
PB: predicated region body
PF: predicated region fallthrough
CT: control target
= control target key end

     0   :  { %8 = vsyncpa [#allocation4], 0  ;;  %s681_s0 = inlined_call_operand.vmem [shape: bf16[4,16,9], index: 0, kind: input, shape index: {}]   ;;  %s682_s1 = inlined_call_operand.vmem [shape: bf16[4,8,16], index: 1, kind: input, shape index: {}]   ;;  %s683_s2 = inlined_call_operand.vmem [shape: bf16[40,128], index: 2, kind: input, shape index: {}]   ;;  %s684_s3 = inlined_call_operand.hbm [shape: f32[4,1,128], index: 3, kind: output, shape index: {}]  }
   0x1   :  { %10 = vsyncpa [#allocation4 + $0x1], 0  ;;  %s580_s12 = smov 0   ;;  %s582_s13 = smov 0  }
   0x2   :  { %s584_s14 = smov 0   ;;  %s586_s15 = smov 0  }
   0x3 LB: > { %s601_s16 = sadd.s32 4294967295, %s555_s15   ;;  %s413_s17 = sadd.s32 4294967294, %s555_s15   ;;  %s555_s15 = sphi %s586_s15, %s690_s15   ;;  %s551_s14 = sphi %s584_s14, %s689_s14   ;;  %s547_s13 = sphi %s582_s13, %s688_s13   ;;  %s543_s12 = sphi %s580_s12, %s687_s12  }
   0x4   : > { %s605_s18 = sadd.s32 1, %s555_s15   ;;  %s96_s19 = sadd.s32 1, %s551_s14 }
   0x5   : > { %s93_s20 = ssub.s32 %s555_s15, %s605_s18  ;;  %p106_p0 = scmp.ne.s32.totalorder %s551_s14, %s547_s13 }
   0x6   : > { %p94_p1 = scmp.eq.s32.totalorder %s93_s20, 0  ;;  %p107_p2 = scmp.eq.s32.totalorder %s601_s16, 3 }
   0x7   : > { %p112_p3 = scmp.ne.s32.totalorder %s547_s13, %s543_s12  ;;  %p113_p4 = scmp.eq.s32.totalorder %s413_s17, 3 }
   0x8   : > { %s616_s21 = scalar_select %p94_p1, %s551_s14, %s96_s19  }
   0x9   : > { %p618_p5 = por %p107_p2, %p106_p0  ;;  %p622_p6 = por %p113_p4, %p112_p3 }
   0xa   : > { %p416_p7 = scmp.ge.s32.totalorder %s555_s15, 1  ;;  %p149_p8 = scmp.lt.s32.totalorder %s555_s15, 5 }
   0xc   : > { %p150_p9 = pnand %p416_p7, %p149_p8 }
   0xd   : > { %p176_p10 = scmp.lt.s32.totalorder (!%p150_p9), %s601_s16, 3  ;;  %s558_s4 = smov (!%p150_p9), 127  }
   0xe   : > { %153 = sbr.rel (%p150_p9) target bundleno = 934 (0x3a6), region = 32  ;;  %s559_s9 = smov (!%p150_p9), 16  }
   0xf   : > { %s174_s20 = sand.u32 (!%p150_p9), 1, %s547_s13   ;;  %s342_s26 = scalar_lea.hbm (!%p150_p9), %s684_s3, %s601_s16 }
  0x10   : > { %s175_s27 = scalar_lea.vmem (!%p150_p9), [#allocation3], %s174_s20  ;;  %s346_s29 = sshll.u32 (!%p150_p9), %s342_s26, 4  ;;  %s347_s29 = int_to_ptr.hbm [resolvable:$true] %s346_s29 }
  0x11   : > { %s334_s30 = scalar_lea.sflag (!%p150_p9), [#allocation4], %s174_s20  ;;  %s513_s7 = scalar_lea.hbm (!%p150_p9), %s684_s3, 4 }
  0x13   : > { %v557_v0 = vmov 0   ;;  %s630_s24 = scalar_select %p176_p10, %s601_s16, 3  ;;  %v193_v2 = vld [vmem:[%s683_s2 + $0x10] sm:$0x3]  ;;  %vm200_vm0 = vcmask 130048   ;;  %vm227_vm1 = vcmask 58368  }
  0x14   : > { %484 = vset.pattern.permute.xlu0 %v557_v0  ;;  %vm257_vm2 = vcmask 1043456   ;;  %vm253_vm7 = vcmask 64512   ;;  %vm274_vm8 = vcmask 122880   ;;  %v441_v32 = vld [vmem:[%s683_s2 + $0x8] sm:$0xff]  ;;  %v440_v33 = vld [vmem:[%s683_s2] sm:$0xff]  ;;  %vm280_vm9 = vcmask 255105  }
  0x15   : > { %s438_s25 = sshll.u32 %s630_s24, 3  ;;  %s419_s5 = sshll.u32 %s630_s24, 2  ;;  %306 = vmatpush.bf16.msra.mxu2 %v441_v32  ;;  %vm296_vm10 = vcmask 261120  }
  0x16   : > { %s180_s28 = scalar_lea.vmem %s681_s0, %s438_s25  ;;  %s184_s8 = scalar_lea.vmem %s682_s1, %s419_s5 }
  0x17   : > { %v439_v1 = vld [vmem:[%s180_s28] sm:$0xff]  ;;  %s344_s28 = sshll.u32 %s175_s27, 4  ;;  %s507_s16 = sshra.s32 %s347_s29, 4  ;;  %s345_s28 = int_to_ptr.vmem [resolvable:$true] %s344_s28  ;;  %s508_s16 = int_to_ptr.hbm [resolvable:$true] %s507_s16 }
  0x18   : > { %211 = vmatpush.bf16.msra.mxu0 %v439_v1  ;;  %v188_v15 = vld [vmem:[%s184_s8] sm:$0xf]  ;;  %p514_p0 = scmp.lt.s32.totalorder %s508_s16, %s684_s3 }
  0x19   : > { %v259_v16 = vsel %vm257_vm2, %v188_v15, 0  ;;  %307 = vmatpush.bf16.msra.mxu2 %v440_v33 }
  0x1a   : > { %268 = vmatpush.bf16.msra.mxu1 %v259_v16 }
  0x1b   : > { %424 = vmatmul.msk.bf16.vlgmr.msra.gmra.mxu0 %vm200_vm0, %v193_v2 }
  0x98   : > { %v213_v3 = vpop.f32.mrf.mxu0 }
  0x99   : > { %219 = vperm.xlu0 %484, %v213_v3   ;;  %v222_v4 = vrot.slane %v213_v3, 2 }
  0xa0   : > { %v215_v5 = vpop.f32.mrf.mxu0 }
  0xa1   : > { %223 = vrot.lane.b32.xlu0 %v222_v4, %s558_s4  ;;  %s509_s4 = scalar_lea.hbm %s508_s16, 1 }
  0xa2   : > { %p510_p11 = scmp.ne.s32.totalorder %s508_s16, %s509_s4  ;;  %p515_p1 = scmp.lt.s32.totalorder %s513_s7, %s509_s4 }
  0xa4   : > { %p511_p12 = pnand %p510_p11, %p618_p5  ;;  %p516_p2 = por %p515_p1, %p514_p0 }
  0xa6   : > { %p512_p13 = pneg %p511_p12 }
  0xa8   : > { %p517_p3 = pnand %p516_p2, %p512_p13 }
 0x10b   : > { %v220_v6 = vpop.permute.xlu0 %219 }
 0x113   : > { %v224_v7 = vpop.permute.xlu0 %223 }
 0x114   : > { %v226_v8 = vadd.f32 %v224_v7, %v220_v6 }
 0x116   : > { %v228_v9 = vsel %vm227_vm1, %v226_v8, -inf }
 0x117   : > { %229 = vmax.xlane.f32.xlu1 %v228_v9 }
 0x18a   : > { %v230_v10 = vpop.xlane.xlu1 %229 }
 0x18b   : > { %v231_v11 = vsub.f32 %v226_v8, %v230_v10 }
 0x18d   : > { %v232_v12 = vmul.f32 1.442695, %v231_v11 }
 0x18f   : > { %485 = vpow2.f32 %v232_v12 }
 0x195   : > { %v486_v13 = vpop.eup %485 }
 0x196   : > { %v234_v14 = vsel %vm227_vm1, %v486_v13, 0.0 }
 0x197   : > { %235 = vadd.xlane.f32.xlu1 %v234_v14 }
 0x20a   : > { %v236_v17 = vpop.xlane.xlu1 %235 }
 0x20b   : > { %487 = vrcp.f32 %v236_v17  ;;  %v248_v21 = vand.u32 2147483648, %v236_v17  ;;  %v246_v23 = vand.u32 2147483647, %v236_v17  ;;  %vm242_vm4 = vweird.f32 %v236_v17 }
 0x20d   : > { %v249_v25 = vor.u32 1.1754944e-38, %v248_v21  ;;  %vm247_vm6 = vcmp.eq.f32.partialorder %v246_v23, 8.507059e+37 }
 0x211   : > { %v488_v18 = vpop.eup %487 }
 0x212   : > { %v238_v19 = vmul.f32 %v488_v18, %v236_v17  ;;  %vm243_vm3 = vweird.f32 %v488_v18 }
 0x213   : > { %vm244_vm5 = vmor %vm242_vm4, %vm243_vm3 }
 0x214   : > { %v239_v20 = vsub.f32 1.0, %v238_v19 }
 0x216   : > { %v240_v22 = vmul.f32 %v488_v18, %v239_v20 }
 0x218   : > { %v241_v24 = vadd.f32 %v488_v18, %v240_v22 }
 0x21a   : > { %v245_v26 = vsel %vm244_vm5, %v488_v18, %v241_v24 }
 0x21b   : > { %v250_v27 = vsel %vm247_vm6, %v249_v25, %v245_v26 }
 0x21c   : > { %v251_v28 = vmul.f32 %v486_v13, %v250_v27 }
 0x21e   : > { %v252_v29 = vpack.c.bf16 %v251_v28, %v251_v28 }
 0x220   : > { %425 = vmatmul.msk.bf16.vlgmr.msra.gmra.mxu1 %vm253_vm7, %v252_v29 }
 0x29d   : > { %v270_v30 = vpop.f32.mrf.mxu1 }
 0x29e   : > { %275 = vst.msk [vmem:[#allocation2] sm:$0x1] %vm274_vm8, %v270_v30  ;;  %277 = vrot.lane.b32.xlu2 %v270_v30, %s559_s9 }
 0x2a5   : > { %v272_v31 = vpop.f32.mrf.mxu1 }
 0x2f8   : > { %v278_v34 = vpop.permute.xlu2 %277 }
 0x2f9   : > { %281 = vst.msk [vmem:[#allocation2 - $0x1] sm:$0x2] %vm280_vm9, %v278_v34 }
 0x300   : > { %v282_v35 = vld [vmem:[#allocation2] sm:$0x1] }
 0x301   : > { %v283_v36 = vpack.c.bf16 %v282_v35, %v282_v35 }
 0x303   : > { %434 = vmatmul.msk.bf16.vlgmr.msra.gmra.mxu2 %vm296_vm10, %v283_v36 }
 0x386   : > { %v309_v37 = vpop.f32.mrf.mxu2 }
 0x387   : > { %v435_v38 = vmul.f32 -1.442695, %v309_v37 }
 0x389   : > { %489 = vpow2.f32 %v435_v38 }
 0x38e   : > { %v311_v39 = vpop.f32.mrf.mxu2 }
 0x38f   : > { %v490_v40 = vpop.eup %489 }
 0x390   : > { %v316_v41 = vadd.f32 1.0, %v490_v40 }
 0x392   : > { %491 = vrcp.f32 %v316_v41  ;;  %v328_v45 = vand.u32 2147483648, %v316_v41  ;;  %v326_v47 = vand.u32 2147483647, %v316_v41  ;;  %vm322_vm12 = vweird.f32 %v316_v41 }
 0x394   : > { %v329_v49 = vor.u32 1.1754944e-38, %v328_v45  ;;  %vm327_vm14 = vcmp.eq.f32.partialorder %v326_v47, 8.507059e+37 }
 0x398   : > { %v492_v42 = vpop.eup %491 }
 0x399   : > { %v318_v43 = vmul.f32 %v492_v42, %v316_v41  ;;  %vm323_vm11 = vweird.f32 %v492_v42 }
 0x39a   : > { %vm324_vm13 = vmor %vm322_vm12, %vm323_vm11 }
 0x39b   : > { %v319_v44 = vsub.f32 1.0, %v318_v43 }
 0x39d   : > { %v320_v46 = vmul.f32 %v492_v42, %v319_v44 }
 0x39f   : > { %v321_v48 = vadd.f32 %v492_v42, %v320_v46 }
 0x3a1   : > { %v325_v50 = vsel %vm324_vm13, %v492_v42, %v321_v48 }
 0x3a2   : > { %v330_v51 = vsel %vm327_vm14, %v329_v49, %v325_v50 }
 0x3a3   : > { %332 = vst [vmem:[%s175_s27] sm:$0x1] %v330_v51 }
 0x3a4   : > { %520 = shalt.err (!%p517_p3)
}
 0x3a5   : > { %442 = dma.vmem_to_hbm [thread:$0]  (%p618_p5), %s345_s28, 16, %s347_s29, %s334_s30  }
 0x3a6 PF: > { %p448_p4 = scmp.ge.s32.totalorder %s555_s15, 2  ;;  %s358_s10 = sand.u32 1, %s543_s12  }
 0x3a7   : > { %s359_s11 = scalar_lea.sflag [#allocation4], %s358_s10 }
 0x3a8   : > { %p445_p7 = pnand %p448_p4, %p622_p6 }
 0x3aa   : > { %p446_p8 = pneg %p445_p7 }
 0x3ac   : > { %538 = dma.done.wait (%p446_p8), %s359_s11, 16  }
 0x3ad   : > { %540 = vsyncadd (%p446_p8), %s359_s11, 4294967280  ;;  %p13_p9 = scmp.ge.s32.totalorder %s605_s18, 6   ;;  %s687_s12 = smov %s547_s13 }
 0x3ae   : > { %s688_s13 = smov %s551_s14  ;;  %s689_s14 = smov %s616_s21 }
 0x3af   : > { %s690_s15 = smov %s605_s18  ;;  %15 = sbr.rel (!%p13_p9) target bundleno = 3 (0x3), region = 70 }
 0x3b4   :  { %364 = vsyncpa [#allocation4], 1 }
 0x3b5   :  { %366 = vsyncpa [#allocation4 + $0x1], 1 }

</bundles_post_ra>
